<compile_context>
chip_gen: v5e
topology: v5e:2x2
jax: 0.10.0
libtpu: 0.0.40
codegen_flags: <defaults>
</compile_context>

<pallas_src>
import functools
import math

import jax
import jax.numpy as jnp
from jax.experimental import pallas as pl
from jax.experimental.pallas import tpu as pltpu


def _round_up(a, b):
    return ((a + b - 1) // b) * b


# ----------------------------------------------------------------------------
# Kernel: one grid step processes `bw` windows.
# ----------------------------------------------------------------------------
def _window_attn_kernel(x_ref, wqkv_ref, bqkv_ref, bias_ref, wproj_ref,
                        bproj_ref, o_ref, *, bw, n, c, num_heads, n_mask):
    """
    x_ref     : (bw*n, c)          window-batch activations (compute dtype)
    wqkv_ref  : (c, 3c)            qkv weight, query columns pre-scaled
    bqkv_ref  : (1, 3c)   f32      qkv bias, query part pre-scaled
    bias_ref  : (H, nW, n, n) f32  rel-pos bias (+ window mask), VMEM-resident
    wproj_ref : (c, c)
    bproj_ref : (1, c)    f32
    o_ref     : (bw*n, c)
    """
    dh = c // num_heads
    m = bw * n
    cdt = x_ref.dtype

    x = x_ref[...]                                            # (M, C)

    # Fused QKV projection: one MXU-shaped GEMM for the whole window batch.
    qkv = jnp.dot(x, wqkv_ref[...], preferred_element_type=jnp.float32)
    qkv = (qkv + bqkv_ref[...]).astype(cdt)                   # (M, 3C)

    w_proj = wproj_ref[...]                                   # (C, C)

    acc = None
    for h in range(num_heads):                                # static, small H
        # (M, Dh) slices -> (Bw, N, Dh); N % 8 == 0 makes the reshape free.
        q = qkv[:, h * dh:(h + 1) * dh].reshape(bw, n, dh)
        k = qkv[:, c + h * dh:c + (h + 1) * dh].reshape(bw, n, dh)
        v = qkv[:, 2 * c + h * dh:2 * c + (h + 1) * dh].reshape(bw, n, dh)

        # Scores for all Bw windows of this head in one batched MXU call.
        s = jnp.einsum('bnd,bmd->bnm', q, k,
                       preferred_element_type=jnp.float32)    # (Bw, N, N)

        # Relative-position bias (+ folded window mask). Each block starts at
        # a window index that is a multiple of nW, so window j inside the
        # block uses bias pattern j % nW.
        s = s.reshape(bw // n_mask, n_mask, n, n) + bias_ref[h][None]
        s = s.reshape(bw, n, n)

        # Numerically stable softmax along keys (kept in f32).
        s = s - jnp.max(s, axis=-1, keepdims=True)
        p = jnp.exp(s)
        p = p * pl.reciprocal(jnp.sum(p, axis=-1, keepdims=True), approx=True)

        o_h = jnp.einsum('bnm,bmd->bnd', p.astype(cdt), v,
                         preferred_element_type=jnp.float32)  # (Bw, N, Dh)

        # Fuse head merge into the output projection:
        #   y = sum_h  o_h @ w_proj[h*Dh:(h+1)*Dh, :]    (no concatenate)
        part = jnp.dot(o_h.reshape(m, dh).astype(cdt),
                       w_proj[h * dh:(h + 1) * dh, :],
                       preferred_element_type=jnp.float32)    # (M, C)
        acc = part if acc is None else acc + part

    y = acc + bproj_ref[...]
    o_ref[...] = y.astype(o_ref.dtype)


# ----------------------------------------------------------------------------
# Wrapper
# ----------------------------------------------------------------------------
def window_attention_pallas(x, w_qkv, b_qkv, rel_bias, w_proj, b_proj,
                            num_heads, scale, mask=None, compute_dtype=None,
                            windows_per_step=None):
    """x: (B_, N, C); rel_bias: (H, N, N); mask: (nW, N, N) or None."""
    B_, N, C = x.shape
    H = num_heads
    out_dtype = x.dtype
    cdt = jnp.dtype(compute_dtype) if compute_dtype is not None else x.dtype

    # Fold optional window mask into a per-window bias tensor -> (H, nW, N, N).
    if mask is not None:
        nW = mask.shape[0]
        bias_full = rel_bias[None, :, :, :] + mask[:, None, :, :]
    else:
        nW = 1
        bias_full = rel_bias[None, :, :, :]
    bias_full = jnp.transpose(bias_full, (1, 0, 2, 3)).astype(jnp.float32)

    # Fold the query scale into the QKV weight/bias (zero runtime cost).
    w_qkv_f = w_qkv.at[:, :C].multiply(scale)
    b_qkv_f = b_qkv.at[:C].multiply(scale)

    # Windows per grid step: big enough for MXU-shaped GEMMs (M = Bw*N ~ 1024
    # rows), a multiple of nW (mask pattern inside a block is j % nW) and such
    # that Bw*N is sublane-aligned (multiple of 8).
    lane_align = 8 // math.gcd(N, 8)
    step = math.lcm(nW, lane_align)
    if windows_per_step is None:
        Bw = min(_round_up(B_, step), _round_up(max(1, 1024 // N), step))
    else:
        Bw = _round_up(windows_per_step, step)
    B_pad = _round_up(B_, Bw)
    n_steps = B_pad // Bw

    x2d = x.reshape(B_ * N, C).astype(cdt)
    if B_pad != B_:
        x2d = jnp.pad(x2d, ((0, (B_pad - B_) * N), (0, 0)))  # zero windows: safe

    kernel = functools.partial(_window_attn_kernel, bw=Bw, n=N, c=C,
                               num_heads=H, n_mask=nW)

    dh = C // H
    flops = 2 * B_pad * (N * C * 3 * C + 2 * H * N * N * dh + N * C * C)
    bytes_accessed = int(2 * x2d.size * x2d.dtype.itemsize
                         + (3 * C * C + C * C + 4 * C) * 4
                         + bias_full.size * 4)
    cost = pl.CostEstimate(flops=int(flops),
                           transcendentals=int(B_pad * H * N * N),
                           bytes_accessed=bytes_accessed)

    out2d = pl.pallas_call(
        kernel,
        out_shape=jax.ShapeDtypeStruct((B_pad * N, C), out_dtype),
        grid_spec=pltpu.PrefetchScalarGridSpec(
            num_scalar_prefetch=0,
            grid=(n_steps,),
            in_specs=[
                pl.BlockSpec((Bw * N, C), lambda i: (i, 0)),           # x
                pl.BlockSpec((C, 3 * C), lambda i: (0, 0)),            # w_qkv
                pl.BlockSpec((1, 3 * C), lambda i: (0, 0)),            # b_qkv
                pl.BlockSpec((H, nW, N, N), lambda i: (0, 0, 0, 0)),   # bias
                pl.BlockSpec((C, C), lambda i: (0, 0)),                # w_proj
                pl.BlockSpec((1, C), lambda i: (0, 0)),                # b_proj
            ],
            out_specs=pl.BlockSpec((Bw * N, C), lambda i: (i, 0)),
        ),
        compiler_params=pltpu.CompilerParams(
            dimension_semantics=("parallel",)),
        cost_estimate=cost,
    )(x2d,
      w_qkv_f.astype(cdt),
      b_qkv_f.reshape(1, 3 * C).astype(jnp.float32),
      bias_full,
      w_proj.astype(cdt),
      b_proj.reshape(1, C).astype(jnp.float32))

    return out2d[:B_ * N].reshape(B_, N, C)


# ----------------------------------------------------------------------------
# Parameter / buffer setup (deterministic, mirrors the PyTorch __init__).
# ----------------------------------------------------------------------------
def make_relative_position_index(window_size):
    Wh, Ww = window_size
    coords = jnp.stack(jnp.meshgrid(jnp.arange(Wh), jnp.arange(Ww), indexing="ij"))
    coords_flatten = coords.reshape(2, -1)                                # (2, N)
    rel = coords_flatten[:, :, None] - coords_flatten[:, None, :]         # (2, N, N)
    rel = rel.transpose(1, 2, 0)                                          # (N, N, 2)
    rel = rel.at[:, :, 0].add(Wh - 1)
    rel = rel.at[:, :, 1].add(Ww - 1)
    rel = rel.at[:, :, 0].multiply(2 * Ww - 1)
    return rel.sum(-1)                                                    # (N, N)


def init_params(key, dim, window_size, num_heads):
    Wh, Ww = window_size
    k1, k2, k3, k4, k5 = jax.random.split(key, 5)
    table = 0.02 * jax.random.normal(
        k1, ((2 * Wh - 1) * (2 * Ww - 1), num_heads), jnp.float32)
    w_qkv = 0.02 * jax.random.normal(k2, (dim, 3 * dim), jnp.float32)
    b_qkv = 0.02 * jax.random.normal(k3, (3 * dim,), jnp.float32)
    w_proj = 0.02 * jax.random.normal(k4, (dim, dim), jnp.float32)
    b_proj = 0.02 * jax.random.normal(k5, (dim,), jnp.float32)
    return table, w_qkv, b_qkv, w_proj, b_proj


def relative_position_bias(table, rel_index, window_size, num_heads):
    Wh, Ww = window_size
    N = Wh * Ww
    bias = table[rel_index.reshape(-1)].reshape(N, N, num_heads)
    return bias.transpose(2, 0, 1)                                        # (H, N, N)


# Pure-JAX reference (same math as the PyTorch forward).
def window_attention_ref(x, w_qkv, b_qkv, rel_bias, w_proj, b_proj,
                         num_heads, scale, mask=None):
    B_, N, C = x.shape
    H = num_heads
    Dh = C // H
    qkv = x @ w_qkv + b_qkv
    qkv = qkv.reshape(B_, N, 3, H, Dh).transpose(2, 0, 3, 1, 4)
    q, k, v = qkv[0], qkv[1], qkv[2]
    attn = (q * scale) @ k.transpose(0, 1, 3, 2)
    attn = attn + rel_bias[None]
    if mask is not None:
        nW = mask.shape[0]
        attn = attn.reshape(B_ // nW, nW, H, N, N) + mask[None, :, None]
        attn = attn.reshape(B_, H, N, N)
    attn = jax.nn.softmax(attn, axis=-1)
    out = (attn @ v).transpose(0, 2, 1, 3).reshape(B_, N, C)
    return out @ w_proj + b_proj


if __name__ == "__main__":
    # Window 4x4 -> N=16 tokens, dim=32 channels, 4 heads.
    dim = 32
    window_size = (4, 4)
    num_heads = 4
    N = window_size[0] * window_size[1]
    head_dim = dim // num_heads
    scale = head_dim ** (-0.5)
    # TODO(synk): attn_drop / proj_drop are identity at inference (p=0.0); dropout not implemented.

    key = jax.random.PRNGKey(0)
    kp, kx, km = jax.random.split(key, 3)
    table, w_qkv, b_qkv, w_proj, b_proj = init_params(kp, dim, window_size, num_heads)
    rel_index = make_relative_position_index(window_size)
    rel_bias = relative_position_bias(table, rel_index, window_size, num_heads)

    # ---- case 1: no mask, B_ = 2 windows ----
    x1 = jax.random.normal(kx, (2, N, dim), jnp.float32)
    out1 = window_attention_pallas(x1, w_qkv, b_qkv, rel_bias, w_proj, b_proj,
                                   num_heads, scale, mask=None)
    jax.block_until_ready(out1)
    ref1 = window_attention_ref(x1, w_qkv, b_qkv, rel_bias, w_proj, b_proj,
                                num_heads, scale, mask=None)
    assert jnp.allclose(out1, ref1, atol=1e-3, rtol=1e-3)

    # ---- case 1b: same inputs, forces window padding (Bw=8 > B_=2) ----
    out1b = window_attention_pallas(x1, w_qkv, b_qkv, rel_bias, w_proj, b_proj,
                                    num_heads, scale, mask=None,
                                    windows_per_step=8)
    jax.block_until_ready(out1b)
    assert jnp.allclose(out1b, ref1, atol=1e-3, rtol=1e-3)

    # ---- case 2: shifted-window mask, nW=2, batch=2 -> B_=4 ----
    nW = 2
    x2 = jax.random.normal(kx, (2 * nW, N, dim), jnp.float32)
    mask_bits = jax.random.bernoulli(km, 0.25, (nW, N, N))
    mask = jnp.where(mask_bits, -100.0, 0.0).astype(jnp.float32)
    out2 = window_attention_pallas(x2, w_qkv, b_qkv, rel_bias, w_proj, b_proj,
                                   num_heads, scale, mask=mask)
    jax.block_until_ready(out2)
    ref2 = window_attention_ref(x2, w_qkv, b_qkv, rel_bias, w_proj, b_proj,
                                num_heads, scale, mask=mask)
    assert jnp.allclose(out2, ref2, atol=1e-3, rtol=1e-3)

    # ---- case 2b: same, but multi-step grid (2 windows per step) ----
    out2b = window_attention_pallas(x2, w_qkv, b_qkv, rel_bias, w_proj, b_proj,
                                    num_heads, scale, mask=mask,
                                    windows_per_step=2)
    jax.block_until_ready(out2b)
    assert jnp.allclose(out2b, ref2, atol=1e-3, rtol=1e-3)

    # ---- case 3: bf16 matmul operands (f32 accumulation / softmax) ----
    out3 = window_attention_pallas(x2, w_qkv, b_qkv, rel_bias, w_proj, b_proj,
                                   num_heads, scale, mask=mask,
                                   compute_dtype=jnp.bfloat16)
    jax.block_until_ready(out3)
    assert jnp.allclose(out3.astype(jnp.float32), ref2, atol=2e-2, rtol=2e-2)

    print("KERNEL_OK")
</pallas_src>

<mosaic_0001>
module attributes {stable_mosaic.version = 11 : i64} {
  func.func @_window_attn_kernel(%arg0: i32, %arg1: memref<32x32xf32, #tpu.memory_space<vmem>>, %arg2: memref<32x96xf32, #tpu.memory_space<vmem>>, %arg3: memref<1x96xf32, #tpu.memory_space<vmem>>, %arg4: memref<4x1x16x16xf32, #tpu.memory_space<vmem>>, %arg5: memref<32x32xf32, #tpu.memory_space<vmem>>, %arg6: memref<1x32xf32, #tpu.memory_space<vmem>>, %arg7: memref<32x32xf32, #tpu.memory_space<vmem>>) attributes {dimension_semantics = [#tpu.dimension_semantics<parallel>], iteration_bounds = array<i64: 1>, scalar_prefetch = 0 : i64, scratch_operands = 0 : i64, tpu.core_type = #tpu.core_type<tc>, window_params = [{transform_indices = @transform_0, window_bounds = array<i64: 32, 32>}, {pipeline_mode = #tpu.pipeline_mode<synchronous>, transform_indices = @transform_1, window_bounds = array<i64: 32, 96>}, {pipeline_mode = #tpu.pipeline_mode<synchronous>, transform_indices = @transform_2, window_bounds = array<i64: 1, 96>}, {pipeline_mode = #tpu.pipeline_mode<synchronous>, transform_indices = @transform_3, window_bounds = array<i64: 4, 1, 16, 16>}, {pipeline_mode = #tpu.pipeline_mode<synchronous>, transform_indices = @transform_4, window_bounds = array<i64: 32, 32>}, {pipeline_mode = #tpu.pipeline_mode<synchronous>, transform_indices = @transform_5, window_bounds = array<i64: 1, 32>}, {transform_indices = @transform_6, window_bounds = array<i64: 32, 32>}]} {
    %c0 = arith.constant 0 : index
    %c0_0 = arith.constant 0 : index
    %0 = vector.load %arg1[%c0, %c0_0] : memref<32x32xf32, #tpu.memory_space<vmem>>, vector<32x32xf32>
    %c0_1 = arith.constant 0 : index
    %c0_2 = arith.constant 0 : index
    %1 = vector.load %arg2[%c0_1, %c0_2] : memref<32x96xf32, #tpu.memory_space<vmem>>, vector<32x96xf32>
    %cst = arith.constant dense<0.000000e+00> : vector<32x96xf32>
    %2 = tpu.matmul %0, %1, %cst {dimension_numbers = #tpu.dot_dimension_numbers<[1], [0], [0], [1], [0, 0, 1, 1], [], []>} : vector<32x32xf32>, vector<32x96xf32>, vector<32x96xf32> -> vector<32x96xf32>
    %c0_3 = arith.constant 0 : index
    %c0_4 = arith.constant 0 : index
    %3 = vector.load %arg3[%c0_3, %c0_4] : memref<1x96xf32, #tpu.memory_space<vmem>>, vector<1x96xf32>
    %4 = vector.broadcast %3 : vector<1x96xf32> to vector<32x96xf32>
    %5 = arith.addf %2, %4 : vector<32x96xf32>
    %c0_5 = arith.constant 0 : index
    %c0_6 = arith.constant 0 : index
    %6 = vector.load %arg5[%c0_5, %c0_6] : memref<32x32xf32, #tpu.memory_space<vmem>>, vector<32x32xf32>
    %7 = vector.extract_strided_slice %5 {offsets = [0, 0], sizes = [32, 8], strides = [1, 1]} : vector<32x96xf32> to vector<32x8xf32>
    %8 = vector.shape_cast %7 : vector<32x8xf32> to vector<2x16x8xf32>
    %9 = vector.extract_strided_slice %5 {offsets = [0, 32], sizes = [32, 8], strides = [1, 1]} : vector<32x96xf32> to vector<32x8xf32>
    %10 = vector.shape_cast %9 : vector<32x8xf32> to vector<2x16x8xf32>
    %11 = vector.extract_strided_slice %5 {offsets = [0, 64], sizes = [32, 8], strides = [1, 1]} : vector<32x96xf32> to vector<32x8xf32>
    %12 = vector.shape_cast %11 : vector<32x8xf32> to vector<2x16x8xf32>
    "tpu.trace_start"() <{level = 10 : i32, message = "bnd,bmd->bnm"}> : () -> ()
    %cst_7 = arith.constant dense<0.000000e+00> : vector<2x16x16xf32>
    %13 = tpu.matmul %8, %10, %cst_7 {dimension_numbers = #tpu.dot_dimension_numbers<[2], [2], [1], [1], [0, 0, 0, 1, 1, 1], [0], [0]>} : vector<2x16x8xf32>, vector<2x16x8xf32>, vector<2x16x16xf32> -> vector<2x16x16xf32>
    "tpu.trace_stop"() : () -> ()
    %14 = vector.shape_cast %13 : vector<2x16x16xf32> to vector<2x1x16x16xf32>
    %c0_8 = arith.constant 0 : index
    %c0_9 = arith.constant 0 : index
    %c0_10 = arith.constant 0 : index
    %c0_11 = arith.constant 0 : index
    %15 = vector.load %arg4[%c0_8, %c0_9, %c0_10, %c0_11] : memref<4x1x16x16xf32, #tpu.memory_space<vmem>>, vector<1x1x16x16xf32>
    %16 = vector.shape_cast %15 : vector<1x1x16x16xf32> to vector<1x16x16xf32>
    %17 = vector.shape_cast %16 : vector<1x16x16xf32> to vector<1x1x16x16xf32>
    %18 = vector.broadcast %17 : vector<1x1x16x16xf32> to vector<2x1x16x16xf32>
    %19 = arith.addf %14, %18 : vector<2x1x16x16xf32>
    %20 = vector.shape_cast %19 : vector<2x1x16x16xf32> to vector<2x16x16xf32>
    %cst_12 = arith.constant dense<0xFF800000> : vector<2x16xf32>
    %21 = vector.multi_reduction <maximumf>, %20, %cst_12 [2] : vector<2x16x16xf32> to vector<2x16xf32>
    %22 = vector.shape_cast %21 : vector<2x16xf32> to vector<2x16x1xf32>
    %23 = vector.broadcast %22 : vector<2x16x1xf32> to vector<2x16x16xf32>
    %24 = arith.subf %20, %23 : vector<2x16x16xf32>
    %25 = math.exp %24 : vector<2x16x16xf32>
    %cst_13 = arith.constant dense<0.000000e+00> : vector<2x16xf32>
    %26 = vector.multi_reduction <add>, %25, %cst_13 [2] : vector<2x16x16xf32> to vector<2x16xf32>
    %27 = vector.shape_cast %26 : vector<2x16xf32> to vector<2x16x1xf32>
    %28 = tpu.reciprocal %27 {approx = true} : vector<2x16x1xf32> -> vector<2x16x1xf32>
    %29 = vector.broadcast %28 : vector<2x16x1xf32> to vector<2x16x16xf32>
    %30 = arith.mulf %25, %29 : vector<2x16x16xf32>
    "tpu.trace_start"() <{level = 10 : i32, message = "bnm,bmd->bnd"}> : () -> ()
    %cst_14 = arith.constant dense<0.000000e+00> : vector<2x16x8xf32>
    %31 = tpu.matmul %30, %12, %cst_14 {dimension_numbers = #tpu.dot_dimension_numbers<[2], [1], [1], [2], [0, 0, 0, 1, 1, 2], [0], [0]>} : vector<2x16x16xf32>, vector<2x16x8xf32>, vector<2x16x8xf32> -> vector<2x16x8xf32>
    "tpu.trace_stop"() : () -> ()
    %32 = vector.shape_cast %31 : vector<2x16x8xf32> to vector<32x8xf32>
    %33 = vector.extract_strided_slice %6 {offsets = [0, 0], sizes = [8, 32], strides = [1, 1]} : vector<32x32xf32> to vector<8x32xf32>
    %cst_15 = arith.constant dense<0.000000e+00> : vector<32x32xf32>
    %34 = tpu.matmul %32, %33, %cst_15 {dimension_numbers = #tpu.dot_dimension_numbers<[1], [0], [0], [1], [0, 0, 1, 1], [], []>} : vector<32x8xf32>, vector<8x32xf32>, vector<32x32xf32> -> vector<32x32xf32>
    %35 = vector.extract_strided_slice %5 {offsets = [0, 8], sizes = [32, 8], strides = [1, 1]} : vector<32x96xf32> to vector<32x8xf32>
    %36 = vector.shape_cast %35 : vector<32x8xf32> to vector<2x16x8xf32>
    %37 = vector.extract_strided_slice %5 {offsets = [0, 40], sizes = [32, 8], strides = [1, 1]} : vector<32x96xf32> to vector<32x8xf32>
    %38 = vector.shape_cast %37 : vector<32x8xf32> to vector<2x16x8xf32>
    %39 = vector.extract_strided_slice %5 {offsets = [0, 72], sizes = [32, 8], strides = [1, 1]} : vector<32x96xf32> to vector<32x8xf32>
    %40 = vector.shape_cast %39 : vector<32x8xf32> to vector<2x16x8xf32>
    "tpu.trace_start"() <{level = 10 : i32, message = "bnd,bmd->bnm"}> : () -> ()
    %cst_16 = arith.constant dense<0.000000e+00> : vector<2x16x16xf32>
    %41 = tpu.matmul %36, %38, %cst_16 {dimension_numbers = #tpu.dot_dimension_numbers<[2], [2], [1], [1], [0, 0, 0, 1, 1, 1], [0], [0]>} : vector<2x16x8xf32>, vector<2x16x8xf32>, vector<2x16x16xf32> -> vector<2x16x16xf32>
    "tpu.trace_stop"() : () -> ()
    %42 = vector.shape_cast %41 : vector<2x16x16xf32> to vector<2x1x16x16xf32>
    %c1 = arith.constant 1 : index
    %c0_17 = arith.constant 0 : index
    %c0_18 = arith.constant 0 : index
    %c0_19 = arith.constant 0 : index
    %43 = vector.load %arg4[%c1, %c0_17, %c0_18, %c0_19] : memref<4x1x16x16xf32, #tpu.memory_space<vmem>>, vector<1x1x16x16xf32>
    %44 = vector.shape_cast %43 : vector<1x1x16x16xf32> to vector<1x16x16xf32>
    %45 = vector.shape_cast %44 : vector<1x16x16xf32> to vector<1x1x16x16xf32>
    %46 = vector.broadcast %45 : vector<1x1x16x16xf32> to vector<2x1x16x16xf32>
    %47 = arith.addf %42, %46 : vector<2x1x16x16xf32>
    %48 = vector.shape_cast %47 : vector<2x1x16x16xf32> to vector<2x16x16xf32>
    %cst_20 = arith.constant dense<0xFF800000> : vector<2x16xf32>
    %49 = vector.multi_reduction <maximumf>, %48, %cst_20 [2] : vector<2x16x16xf32> to vector<2x16xf32>
    %50 = vector.shape_cast %49 : vector<2x16xf32> to vector<2x16x1xf32>
    %51 = vector.broadcast %50 : vector<2x16x1xf32> to vector<2x16x16xf32>
    %52 = arith.subf %48, %51 : vector<2x16x16xf32>
    %53 = math.exp %52 : vector<2x16x16xf32>
    %cst_21 = arith.constant dense<0.000000e+00> : vector<2x16xf32>
    %54 = vector.multi_reduction <add>, %53, %cst_21 [2] : vector<2x16x16xf32> to vector<2x16xf32>
    %55 = vector.shape_cast %54 : vector<2x16xf32> to vector<2x16x1xf32>
    %56 = tpu.reciprocal %55 {approx = true} : vector<2x16x1xf32> -> vector<2x16x1xf32>
    %57 = vector.broadcast %56 : vector<2x16x1xf32> to vector<2x16x16xf32>
    %58 = arith.mulf %53, %57 : vector<2x16x16xf32>
    "tpu.trace_start"() <{level = 10 : i32, message = "bnm,bmd->bnd"}> : () -> ()
    %cst_22 = arith.constant dense<0.000000e+00> : vector<2x16x8xf32>
    %59 = tpu.matmul %58, %40, %cst_22 {dimension_numbers = #tpu.dot_dimension_numbers<[2], [1], [1], [2], [0, 0, 0, 1, 1, 2], [0], [0]>} : vector<2x16x16xf32>, vector<2x16x8xf32>, vector<2x16x8xf32> -> vector<2x16x8xf32>
    "tpu.trace_stop"() : () -> ()
    %60 = vector.shape_cast %59 : vector<2x16x8xf32> to vector<32x8xf32>
    %61 = vector.extract_strided_slice %6 {offsets = [8, 0], sizes = [8, 32], strides = [1, 1]} : vector<32x32xf32> to vector<8x32xf32>
    %cst_23 = arith.constant dense<0.000000e+00> : vector<32x32xf32>
    %62 = tpu.matmul %60, %61, %cst_23 {dimension_numbers = #tpu.dot_dimension_numbers<[1], [0], [0], [1], [0, 0, 1, 1], [], []>} : vector<32x8xf32>, vector<8x32xf32>, vector<32x32xf32> -> vector<32x32xf32>
    %63 = arith.addf %34, %62 : vector<32x32xf32>
    %64 = vector.extract_strided_slice %5 {offsets = [0, 16], sizes = [32, 8], strides = [1, 1]} : vector<32x96xf32> to vector<32x8xf32>
    %65 = vector.shape_cast %64 : vector<32x8xf32> to vector<2x16x8xf32>
    %66 = vector.extract_strided_slice %5 {offsets = [0, 48], sizes = [32, 8], strides = [1, 1]} : vector<32x96xf32> to vector<32x8xf32>
    %67 = vector.shape_cast %66 : vector<32x8xf32> to vector<2x16x8xf32>
    %68 = vector.extract_strided_slice %5 {offsets = [0, 80], sizes = [32, 8], strides = [1, 1]} : vector<32x96xf32> to vector<32x8xf32>
    %69 = vector.shape_cast %68 : vector<32x8xf32> to vector<2x16x8xf32>
    "tpu.trace_start"() <{level = 10 : i32, message = "bnd,bmd->bnm"}> : () -> ()
    %cst_24 = arith.constant dense<0.000000e+00> : vector<2x16x16xf32>
    %70 = tpu.matmul %65, %67, %cst_24 {dimension_numbers = #tpu.dot_dimension_numbers<[2], [2], [1], [1], [0, 0, 0, 1, 1, 1], [0], [0]>} : vector<2x16x8xf32>, vector<2x16x8xf32>, vector<2x16x16xf32> -> vector<2x16x16xf32>
    "tpu.trace_stop"() : () -> ()
    %71 = vector.shape_cast %70 : vector<2x16x16xf32> to vector<2x1x16x16xf32>
    %c2 = arith.constant 2 : index
    %c0_25 = arith.constant 0 : index
    %c0_26 = arith.constant 0 : index
    %c0_27 = arith.constant 0 : index
    %72 = vector.load %arg4[%c2, %c0_25, %c0_26, %c0_27] : memref<4x1x16x16xf32, #tpu.memory_space<vmem>>, vector<1x1x16x16xf32>
    %73 = vector.shape_cast %72 : vector<1x1x16x16xf32> to vector<1x16x16xf32>
    %74 = vector.shape_cast %73 : vector<1x16x16xf32> to vector<1x1x16x16xf32>
    %75 = vector.broadcast %74 : vector<1x1x16x16xf32> to vector<2x1x16x16xf32>
    %76 = arith.addf %71, %75 : vector<2x1x16x16xf32>
    %77 = vector.shape_cast %76 : vector<2x1x16x16xf32> to vector<2x16x16xf32>
    %cst_28 = arith.constant dense<0xFF800000> : vector<2x16xf32>
    %78 = vector.multi_reduction <maximumf>, %77, %cst_28 [2] : vector<2x16x16xf32> to vector<2x16xf32>
    %79 = vector.shape_cast %78 : vector<2x16xf32> to vector<2x16x1xf32>
    %80 = vector.broadcast %79 : vector<2x16x1xf32> to vector<2x16x16xf32>
    %81 = arith.subf %77, %80 : vector<2x16x16xf32>
    %82 = math.exp %81 : vector<2x16x16xf32>
    %cst_29 = arith.constant dense<0.000000e+00> : vector<2x16xf32>
    %83 = vector.multi_reduction <add>, %82, %cst_29 [2] : vector<2x16x16xf32> to vector<2x16xf32>
    %84 = vector.shape_cast %83 : vector<2x16xf32> to vector<2x16x1xf32>
    %85 = tpu.reciprocal %84 {approx = true} : vector<2x16x1xf32> -> vector<2x16x1xf32>
    %86 = vector.broadcast %85 : vector<2x16x1xf32> to vector<2x16x16xf32>
    %87 = arith.mulf %82, %86 : vector<2x16x16xf32>
    "tpu.trace_start"() <{level = 10 : i32, message = "bnm,bmd->bnd"}> : () -> ()
    %cst_30 = arith.constant dense<0.000000e+00> : vector<2x16x8xf32>
    %88 = tpu.matmul %87, %69, %cst_30 {dimension_numbers = #tpu.dot_dimension_numbers<[2], [1], [1], [2], [0, 0, 0, 1, 1, 2], [0], [0]>} : vector<2x16x16xf32>, vector<2x16x8xf32>, vector<2x16x8xf32> -> vector<2x16x8xf32>
    "tpu.trace_stop"() : () -> ()
    %89 = vector.shape_cast %88 : vector<2x16x8xf32> to vector<32x8xf32>
    %90 = vector.extract_strided_slice %6 {offsets = [16, 0], sizes = [8, 32], strides = [1, 1]} : vector<32x32xf32> to vector<8x32xf32>
    %cst_31 = arith.constant dense<0.000000e+00> : vector<32x32xf32>
    %91 = tpu.matmul %89, %90, %cst_31 {dimension_numbers = #tpu.dot_dimension_numbers<[1], [0], [0], [1], [0, 0, 1, 1], [], []>} : vector<32x8xf32>, vector<8x32xf32>, vector<32x32xf32> -> vector<32x32xf32>
    %92 = arith.addf %63, %91 : vector<32x32xf32>
    %93 = vector.extract_strided_slice %5 {offsets = [0, 24], sizes = [32, 8], strides = [1, 1]} : vector<32x96xf32> to vector<32x8xf32>
    %94 = vector.shape_cast %93 : vector<32x8xf32> to vector<2x16x8xf32>
    %95 = vector.extract_strided_slice %5 {offsets = [0, 56], sizes = [32, 8], strides = [1, 1]} : vector<32x96xf32> to vector<32x8xf32>
    %96 = vector.shape_cast %95 : vector<32x8xf32> to vector<2x16x8xf32>
    %97 = vector.extract_strided_slice %5 {offsets = [0, 88], sizes = [32, 8], strides = [1, 1]} : vector<32x96xf32> to vector<32x8xf32>
    %98 = vector.shape_cast %97 : vector<32x8xf32> to vector<2x16x8xf32>
    "tpu.trace_start"() <{level = 10 : i32, message = "bnd,bmd->bnm"}> : () -> ()
    %cst_32 = arith.constant dense<0.000000e+00> : vector<2x16x16xf32>
    %99 = tpu.matmul %94, %96, %cst_32 {dimension_numbers = #tpu.dot_dimension_numbers<[2], [2], [1], [1], [0, 0, 0, 1, 1, 1], [0], [0]>} : vector<2x16x8xf32>, vector<2x16x8xf32>, vector<2x16x16xf32> -> vector<2x16x16xf32>
    "tpu.trace_stop"() : () -> ()
    %100 = vector.shape_cast %99 : vector<2x16x16xf32> to vector<2x1x16x16xf32>
    %c3 = arith.constant 3 : index
    %c0_33 = arith.constant 0 : index
    %c0_34 = arith.constant 0 : index
    %c0_35 = arith.constant 0 : index
    %101 = vector.load %arg4[%c3, %c0_33, %c0_34, %c0_35] : memref<4x1x16x16xf32, #tpu.memory_space<vmem>>, vector<1x1x16x16xf32>
    %102 = vector.shape_cast %101 : vector<1x1x16x16xf32> to vector<1x16x16xf32>
    %103 = vector.shape_cast %102 : vector<1x16x16xf32> to vector<1x1x16x16xf32>
    %104 = vector.broadcast %103 : vector<1x1x16x16xf32> to vector<2x1x16x16xf32>
    %105 = arith.addf %100, %104 : vector<2x1x16x16xf32>
    %106 = vector.shape_cast %105 : vector<2x1x16x16xf32> to vector<2x16x16xf32>
    %cst_36 = arith.constant dense<0xFF800000> : vector<2x16xf32>
    %107 = vector.multi_reduction <maximumf>, %106, %cst_36 [2] : vector<2x16x16xf32> to vector<2x16xf32>
    %108 = vector.shape_cast %107 : vector<2x16xf32> to vector<2x16x1xf32>
    %109 = vector.broadcast %108 : vector<2x16x1xf32> to vector<2x16x16xf32>
    %110 = arith.subf %106, %109 : vector<2x16x16xf32>
    %111 = math.exp %110 : vector<2x16x16xf32>
    %cst_37 = arith.constant dense<0.000000e+00> : vector<2x16xf32>
    %112 = vector.multi_reduction <add>, %111, %cst_37 [2] : vector<2x16x16xf32> to vector<2x16xf32>
    %113 = vector.shape_cast %112 : vector<2x16xf32> to vector<2x16x1xf32>
    %114 = tpu.reciprocal %113 {approx = true} : vector<2x16x1xf32> -> vector<2x16x1xf32>
    %115 = vector.broadcast %114 : vector<2x16x1xf32> to vector<2x16x16xf32>
    %116 = arith.mulf %111, %115 : vector<2x16x16xf32>
    "tpu.trace_start"() <{level = 10 : i32, message = "bnm,bmd->bnd"}> : () -> ()
    %cst_38 = arith.constant dense<0.000000e+00> : vector<2x16x8xf32>
    %117 = tpu.matmul %116, %98, %cst_38 {dimension_numbers = #tpu.dot_dimension_numbers<[2], [1], [1], [2], [0, 0, 0, 1, 1, 2], [0], [0]>} : vector<2x16x16xf32>, vector<2x16x8xf32>, vector<2x16x8xf32> -> vector<2x16x8xf32>
    "tpu.trace_stop"() : () -> ()
    %118 = vector.shape_cast %117 : vector<2x16x8xf32> to vector<32x8xf32>
    %119 = vector.extract_strided_slice %6 {offsets = [24, 0], sizes = [8, 32], strides = [1, 1]} : vector<32x32xf32> to vector<8x32xf32>
    %cst_39 = arith.constant dense<0.000000e+00> : vector<32x32xf32>
    %120 = tpu.matmul %118, %119, %cst_39 {dimension_numbers = #tpu.dot_dimension_numbers<[1], [0], [0], [1], [0, 0, 1, 1], [], []>} : vector<32x8xf32>, vector<8x32xf32>, vector<32x32xf32> -> vector<32x32xf32>
    %121 = arith.addf %92, %120 : vector<32x32xf32>
    %c0_40 = arith.constant 0 : index
    %c0_41 = arith.constant 0 : index
    %122 = vector.load %arg6[%c0_40, %c0_41] : memref<1x32xf32, #tpu.memory_space<vmem>>, vector<1x32xf32>
    %123 = vector.broadcast %122 : vector<1x32xf32> to vector<32x32xf32>
    %124 = arith.addf %121, %123 : vector<32x32xf32>
    %c0_42 = arith.constant 0 : index
    %c0_43 = arith.constant 0 : index
    %125 = vector.load %arg7[%c0_42, %c0_43] : memref<32x32xf32, #tpu.memory_space<vmem>>, vector<32x32xf32>
    tpu.vector_store %arg7[%c0_42, %c0_43], %124 {strides = array<i32>} : memref<32x32xf32, #tpu.memory_space<vmem>>, vector<32x32xf32>,
    return
  }
  func.func @transform_0(%arg0: i32) -> (i32, i32) {
    %c0_i32 = arith.constant 0 : i32
    %c0_i32_0 = arith.constant 0 : i32
    return %arg0, %c0_i32 : i32, i32
  }
  func.func @transform_1(%arg0: i32) -> (i32, i32) {
    %c0_i32 = arith.constant 0 : i32
    %c0_i32_0 = arith.constant 0 : i32
    %c0_i32_1 = arith.constant 0 : i32
    return %c0_i32, %c0_i32_0 : i32, i32
  }
  func.func @transform_2(%arg0: i32) -> (i32, i32) {
    %c0_i32 = arith.constant 0 : i32
    %c0_i32_0 = arith.constant 0 : i32
    %c0_i32_1 = arith.constant 0 : i32
    return %c0_i32, %c0_i32_0 : i32, i32
  }
  func.func @transform_3(%arg0: i32) -> (i32, i32, i32, i32) {
    %c0_i32 = arith.constant 0 : i32
    %c0_i32_0 = arith.constant 0 : i32
    %c0_i32_1 = arith.constant 0 : i32
    %c0_i32_2 = arith.constant 0 : i32
    %c0_i32_3 = arith.constant 0 : i32
    return %c0_i32, %c0_i32_0, %c0_i32_1, %c0_i32_2 : i32, i32, i32, i32
  }
  func.func @transform_4(%arg0: i32) -> (i32, i32) {
    %c0_i32 = arith.constant 0 : i32
    %c0_i32_0 = arith.constant 0 : i32
    %c0_i32_1 = arith.constant 0 : i32
    return %c0_i32, %c0_i32_0 : i32, i32
  }
  func.func @transform_5(%arg0: i32) -> (i32, i32) {
    %c0_i32 = arith.constant 0 : i32
    %c0_i32_0 = arith.constant 0 : i32
    %c0_i32_1 = arith.constant 0 : i32
    return %c0_i32, %c0_i32_0 : i32, i32
  }
  func.func @transform_6(%arg0: i32) -> (i32, i32) {
    %c0_i32 = arith.constant 0 : i32
    %c0_i32_0 = arith.constant 0 : i32
    return %arg0, %c0_i32 : i32, i32
  }
}

</mosaic_0001>

<bundles_post_ra>
// kernel: tpu_custom_call.1
= control target key start
LH: loop header
LB: loop body
LE: loop exit
PB: predicated region body
PF: predicated region fallthrough
CT: control target
= control target key end

     0   :  { %11 = vsyncpa [#allocation3], 0  ;;  %s1798_s0 = inlined_call_operand.hbm [shape: f32[32,32], index: 0, kind: input, shape index: {}]   ;;  %s1799_s1 = inlined_call_operand.hbm [shape: f32[32,96], index: 1, kind: input, shape index: {}]   ;;  %s1800_s2 = inlined_call_operand.vmem [shape: f32[1,96], index: 2, kind: input, shape index: {}]   ;;  %s1801_s3 = inlined_call_operand.hbm [shape: f32[4,1,16,16], index: 3, kind: input, shape index: {}]   ;;  %s1802_s4 = inlined_call_operand.hbm [shape: f32[32,32], index: 4, kind: input, shape index: {}]   ;;  %s1803_s5 = inlined_call_operand.vmem [shape: f32[1,32], index: 5, kind: input, shape index: {}]   ;;  %s1804_s6 = inlined_call_operand.hbm [shape: f32[32,32], index: 6, kind: output, shape index: {}]  }
   0x1   :  { %12 = vsyncpa [#allocation6], 0 }
   0x2   :  { %13 = vsyncpa [#allocation9], 0 }
   0x3   :  { %14 = vsyncpa [#allocation4], 0  ;;  %s32_s23 = sshll.u32 %s1799_s1, 4  ;;  %s1469_s24 = smov [#allocation5]   ;;  %s33_s23 = int_to_ptr.hbm [resolvable:$true] %s32_s23 }
   0x4   :  { %s34_s25 = sshll.u32 %s1469_s24, 4  ;;  %s19_s28 = sshll.u32 %s1798_s0, 4  ;;  %s35_s25 = int_to_ptr.vmem [resolvable:$true] %s34_s25  ;;  %s20_s28 = int_to_ptr.hbm [resolvable:$true] %s19_s28 }
   0x5   :  { %s1470_s29 = smov 128   ;;  %s1471_s30 = smov 8  }
   0x6   :  { %40 = dma.hbm_to_vmem [thread:$0]  %s33_s23, 512, %s35_s25, [#allocation6], %s1470_s29, %s1470_s29, %s1471_s30  }
   0x7   :  { %s1472_s7 = smov [#allocation2]   ;;  %s47_s1 = sshll.u32 %s1801_s3, 4  ;;  %s48_s1 = int_to_ptr.hbm [resolvable:$true] %s47_s1 }
   0x8   :  { %s21_s8 = sshll.u32 %s1472_s7, 4  ;;  %s60_s12 = sshll.u32 %s1802_s4, 4  ;;  %s22_s8 = int_to_ptr.vmem [resolvable:$true] %s21_s8  ;;  %s61_s12 = int_to_ptr.hbm [resolvable:$true] %s60_s12 }
   0x9   :  { %27 = dma.hbm_to_vmem [thread:$0]  %s20_s28, 512, %s22_s8, [#allocation3], %s1470_s29, %s1470_s29, %s1471_s30  }
   0xa   :  { %s1473_s13 = smov [#allocation7]   ;;  %s1474_s15 = smov [#allocation8]  }
   0xb   :  { %s49_s14 = sshll.u32 %s1473_s13, 4  ;;  %s62_s3 = sshll.u32 %s1474_s15, 4  ;;  %s50_s14 = int_to_ptr.vmem [resolvable:$true] %s49_s14  ;;  %s63_s3 = int_to_ptr.vmem [resolvable:$true] %s62_s3 }
   0xc   :  { %55 = dma.hbm_to_vmem [thread:$0]  %s48_s1, 1024, %s50_s14, [#allocation6], %s1470_s29, %s1470_s29, %s1471_s30  }
   0xd   :  { %68 = dma.hbm_to_vmem [thread:$0]  %s61_s12, 512, %s63_s3, [#allocation9], %s1470_s29, %s1470_s29, %s1471_s30  }
   0xe   :  { %1461 = dma.done.wait [#allocation3], 512  }
   0xf   :  { %1462 = vsyncadd [#allocation3], 4294966784 }
  0x10   :  { %1463 = dma.done.wait [#allocation6], 1536  }
  0x11   :  { %1464 = vsyncadd [#allocation6], 4294965760 }
  0x12   :  { %1465 = dma.done.wait [#allocation9], 512  }
  0x13   :  { %1466 = vsyncadd [#allocation9], 4294966784  ;;  %v94_v0 = vld [vmem:[#allocation5 + $0x18] sm:$0xff]  ;;  %v93_v1 = vld [vmem:[#allocation5 + $0x10] sm:$0xff]  ;;  %vm99_vm0 = vcmask 261120   ;;  %s1475_s17 = smov 96  }
  0x14   :  { %124 = vmatpush.msra.mxu0 %v94_v0  ;;  %1211 = vmatpush.msra.mxu1 %v94_v0  ;;  %v92_v2 = vld [vmem:[#allocation5 + $0x8] sm:$0xff]  ;;  %v91_v3 = vld [vmem:[#allocation5] sm:$0xff]  ;;  %v90_v5 = vld [vmem:[#allocation2 + $0x18] sm:$0xff]  ;;  %s1476_s18 = smov 88   ;;  %s1478_s19 = smov 64   ;;  %vm151_vm1 = vcmask 64512  }
  0x15   :  { %v87_v4 = vld [vmem:[#allocation2] sm:$0xff]  ;;  %v88_v6 = vld [vmem:[#allocation2 + $0x8] sm:$0xff]  ;;  %v89_v7 = vld [vmem:[#allocation2 + $0x10] sm:$0xff]  ;;  %vm226_vm2 = vcmask 130048   ;;  %s1479_s20 = smov 56   ;;  %s1480_s21 = smov 80  }
  0x16   :  { %125 = vmatpush.msra.mxu0 %v93_v1  ;;  %1212 = vmatpush.msra.mxu1 %v93_v1  ;;  %v1275_v8 = vld [vmem:[%s1800_s2] ss:$0 sm:$0xff]  ;;  %s1477_s2 = smov 120   ;;  %v221_v35 = vld [vmem:[#allocation7 + $0x8] sm:$0xff]  ;;  %v1603_v41 = vld [vmem:[#allocation7 + $0x10] sm:$0xff]  ;;  %s1481_s22 = smov 112  }
  0x17   :  { %v220_v30 = vld [vmem:[#allocation7] sm:$0xff]  ;;  %v1608_v46 = vld [vmem:[#allocation7 + $0x18] sm:$0xff]  ;;  %s1482_s23 = smov 72   ;;  %s1483_s24 = smov 48  }
  0x18   :  { %126 = vmatpush.msra.mxu0 %v92_v2  ;;  %1213 = vmatpush.msra.mxu1 %v92_v2  ;;  %s1484_s25 = smov 104   ;;  %s1485_s26 = smov 40  }
  0x19   :  { %s1128_s10 = sshll.u32 %s1804_s6, 4  ;;  %s1129_s10 = int_to_ptr.hbm [resolvable:$true] %s1128_s10 }
  0x1a   :  { %127 = vmatpush.msra.mxu0 %v91_v3  ;;  %1214 = vmatpush.msra.mxu1 %v91_v3 }
  0x1b   :  { %1143 = vmatmul.msk.f32.vlgmr.msra.gmra.mxu0 %vm99_vm0, %v87_v4  ;;  %1146 = vmatmul.msk.f32.vlgmr.msra.gmra.mxu1 %vm99_vm0, %v90_v5 }
  0x23   :  { %1144 = vmatmul.msk.f32.gmra.mxu0 %vm99_vm0, %v88_v6 }
  0x2b   :  { %1145 = vmatmul.msk.f32.gmra.mxu0 %vm99_vm0, %v89_v7 }
  0x98   :  { %v129_v9 = vpop.f32.mrf.mxu0  ;;  %v138_v10 = vpop.f32.mrf.mxu1 }
  0x99   :  { %v1553_v11 = vadd.f32 %v1275_v8, %v138_v10  ;;  %v1561_v15 = vadd.f32 %v1275_v8, %v129_v9 }
  0x9b   :  { %187 = vrot.lane.b32.xlu0 %v1553_v11, %s1475_s17 }
  0xa0   :  { %v132_v12 = vpop.f32.mrf.mxu0 }
  0xa1   :  { %v1556_v13 = vadd.f32 %v1275_v8, %v132_v12 }
  0xa3   :  { %347 = vrot.lane.b32.xlu2 %v1556_v13, %s1476_s18  ;;  %149 = vrot.lane.b32.xlu1 %v1556_v13, %s1475_s17  ;;  %v1618_v50 = vpack.i.bf16 %v1561_v15, %v1556_v13 }
  0xa8   :  { %v135_v14 = vpop.f32.mrf.mxu0 }
  0xa9   :  { %v1563_v16 = vadd.f32 %v1275_v8, %v135_v14 }
  0xab   :  { %185 = vrot.lane.b32.xlu0 %v1563_v16, %s1475_s17  ;;  %345 = vrot.lane.b32.xlu2 %v1561_v15, %s1476_s18  ;;  %v1577_v17 = vpack.i.bf16 %v1563_v16, %v1553_v11 }
  0xac   :  { %147 = vrot.lane.b32.xlu1 %v1561_v15, %s1475_s17 }
  0xb3   :  { %341 = vrot.lane.b32.xlu0 %v1561_v15, %s1477_s2  ;;  %386 = vrot.lane.b32.xlu2 %v1553_v11, %s1476_s18 }
  0xb4   :  { %343 = vrot.lane.b32.xlu1 %v1556_v13, %s1477_s2 }
  0xbc   :  { %1236 = vrot.lane.b32.xlu1 %v1577_v17, %s1478_s19 }
  0xfd   :  { %v348_v20 = vpop.permute.xlu2 %347 }
 0x105   :  { %v346_v23 = vpop.permute.xlu2 %345 }
 0x10d   :  { %v188_v18 = vpop.permute.xlu0 %187  ;;  %v387_v29 = vpop.permute.xlu2 %386 }
 0x10e   :  { %1151 = vmatpush.xpose.msk.msra.mxu2 %vm151_vm1, %v188_v18 }
 0x115   :  { %v150_v19 = vpop.permute.xlu1 %149 }
 0x116   :  { %1147 = vmatpush.xpose.msk.msrb.mxu1 %vm151_vm1, %v150_v19 }
 0x11d   :  { %v186_v21 = vpop.permute.xlu0 %185 }
 0x11e   :  { %v148_v22 = vpop.permute.xlu1 %147  ;;  %1152 = vmatpush.xpose.msk.msra.mxu2 %vm151_vm1, %v186_v21 }
 0x11f   :  { %1148 = vmatpush.xpose.msk.msrb.mxu1 %vm151_vm1, %v148_v22 }
 0x121   :  { %1153 = vmatmul.msk.f32.vlgmr.msra.gmra.mxu2 %vm151_vm1, %v1563_v16 }
 0x122   :  { %1149 = vmatmul.msk.f32.vlgmr.msrb.gmra.mxu1 %vm151_vm1, %v1561_v15 }
 0x123   :  { %1159 = vmatpush.xpose.msk.msra.mxu1 %vm151_vm1, %v348_v20 }
 0x125   :  { %v342_v27 = vpop.permute.xlu0 %341 }
 0x126   :  { %v344_v24 = vpop.permute.xlu1 %343 }
 0x127   :  { %1160 = vmatpush.xpose.msk.msra.mxu1 %vm151_vm1, %v346_v23 }
 0x129   :  { %1154 = vmatmul.msk.f32.gmra.mxu2 %vm151_vm1, %v1553_v11 }
 0x12a   :  { %1150 = vmatmul.msk.f32.gmra.mxu1 %vm151_vm1, %v1556_v13 }
 0x12e   :  { %v1237_v25 = vpop.permute.xlu1 %1236 }
 0x12f   :  { %v1238_v26 = vunpack.i.l.bf16 %v1237_v25  ;;  %v1239_v28 = vunpack.i.h.bf16 %v1237_v25 }
 0x131   :  { %332 = vmatpush.msrb.mxu2 %v1238_v26  ;;  %1215 = vmatpush.msra.mxu3 %v1238_v26 }
 0x132   :  { %1161 = vmatmul.msk.f32.vlgmr.msra.gmra.mxu1 %vm151_vm1, %v342_v27 }
 0x133   :  { %333 = vmatpush.msrb.mxu2 %v1239_v28  ;;  %1216 = vmatpush.msra.mxu3 %v1239_v28 }
 0x135   :  { %1163 = vmatpush.xpose.msk.msra.mxu2 %vm151_vm1, %v387_v29 }
 0x13a   :  { %1162 = vmatmul.msk.f32.gmra.mxu1 %vm151_vm1, %v344_v24 }
 0x19f   :  { %v177_v31 = vpop.f32.mrf.mxu1 }
 0x1a0   :  { %v1598_v32 = vadd.f32 %v220_v30, %v177_v31 }
 0x1a2   :  { %v227_v12 = vsel %vm226_vm2, %v1598_v32, -inf }
 0x1a4   :  { %v214_v33 = vpop.f32.mrf.mxu2 }
 0x1a5   :  { %v224_v34 = vadd.f32 %v220_v30, %v214_v33 }
 0x1a7   :  { %v180_v36 = vpop.f32.mrf.mxu1  ;;  %v233_v37 = vsel %vm226_vm2, %v224_v34, -inf }
 0x1a8   :  { %v1601_v38 = vadd.f32 %v221_v35, %v180_v36  ;;  %234 = vmax.xlane.f32.xlu2 %v233_v37 }
 0x1aa   :  { %v230_v14 = vsel %vm226_vm2, %v1601_v38, -inf }
 0x1ac   :  { %v217_v39 = vpop.f32.mrf.mxu2 }
 0x1ad   :  { %v225_v40 = vadd.f32 %v221_v35, %v217_v39 }
 0x1af   :  { %v374_v42 = vpop.f32.mrf.mxu1  ;;  %v236_v43 = vsel %vm226_vm2, %v225_v40, -inf }
 0x1b0   :  { %v422_v44 = vadd.f32 %v1603_v41, %v374_v42  ;;  %237 = vmax.xlane.f32.xlu0 %v236_v43 }
 0x1b2   :  { %v426_v45 = vsel %vm226_vm2, %v422_v44, -inf }
 0x1b3   :  { %427 = vmax.xlane.f32.xlu1 %v426_v45 }
 0x1b7   :  { %v377_v47 = vpop.f32.mrf.mxu1 }
 0x1b8   :  { %v423_v48 = vadd.f32 %v1608_v46, %v377_v47 }
 0x1ba   :  { %v429_v49 = vsel %vm226_vm2, %v423_v48, -inf }
 0x1bb   :  { %430 = vmax.xlane.f32.xlu2 %v429_v49 }
 0x1c4   :  { %384 = vrot.lane.b32.xlu0 %v1563_v16, %s1476_s18 }
 0x1cc   :  { %380 = vrot.lane.b32.xlu1 %v1563_v16, %s1477_s2 }
 0x1d3   :  { %1241 = vrot.lane.b32.xlu2 %v1618_v50, %s1479_s20 }
 0x21b   :  { %v235_v51 = vpop.xlane.xlu2 %234 }
 0x21c   :  { %v241_v52 = vsub.f32 %v224_v34, %v235_v51 }
 0x21e   :  { %v247_v53 = vmul.f32 1.442695, %v241_v52 }
 0x220   :  { %1277 = vpow2.f32 %v247_v53 }
 0x223   :  { %v238_v55 = vpop.xlane.xlu0 %237 }
 0x224   :  { %v242_v59 = vsub.f32 %v225_v40, %v238_v55 }
 0x226   :  { %v1278_v54 = vpop.eup %1277  ;;  %v428_v56 = vpop.xlane.xlu1 %427  ;;  %v249_v61 = vmul.f32 1.442695, %v242_v59 }
 0x227   :  { %v438_v57 = vsub.f32 %v422_v44, %v428_v56  ;;  %v257_v58 = vsel %vm226_vm2, %v1278_v54, 0.0 }
 0x228   :  { %258 = vadd.xlane.f32.xlu2 %v257_v58 }
 0x229   :  { %v442_v60 = vmul.f32 1.442695, %v438_v57 }
 0x22b   :  { %1279 = vpow2.f32 %v442_v60 }
 0x22c   :  { %1281 = vpow2.f32 %v249_v61 }
 0x22e   :  { %v431_v62 = vpop.xlane.xlu2 %430 }
 0x22f   :  { %v439_v63 = vsub.f32 %v423_v48, %v431_v62 }
 0x231   :  { %v1280_v0 = vpop.eup %1279  ;;  %v444_v1 = vmul.f32 1.442695, %v439_v63  ;;  %v1679_v63 = vld [vmem:[#allocation7 + $0x28] sm:$0xff] }
 0x232   :  { %v450_v2 = vsel %vm226_vm2, %v1280_v0, 0.0  ;;  %v1282_v5 = vpop.eup %1281 }
 0x233   :  { %1283 = vpow2.f32 %v444_v1  ;;  %451 = vadd.xlane.f32.xlu0 %v450_v2  ;;  %v260_v9 = vsel %vm226_vm2, %v1282_v5, 0.0 }
 0x236   :  { %v1242_v3 = vpop.permute.xlu2 %1241  ;;  %v385_v4 = vpop.permute.xlu0 %384 }
 0x237   :  { %1164 = vmatpush.xpose.msk.msra.mxu2 %vm151_vm1, %v385_v4  ;;  %v1243_v6 = vunpack.i.l.bf16 %v1242_v3  ;;  %v1244_v10 = vunpack.i.h.bf16 %v1242_v3 }
 0x239   :  { %v1284_v7 = vpop.eup %1283  ;;  %496 = vmatpush.msrb.mxu3 %v1243_v6 }
 0x23a   :  { %v453_v8 = vsel %vm226_vm2, %v1284_v7, 0.0 }
 0x23b   :  { %454 = vadd.xlane.f32.xlu1 %v453_v8  ;;  %261 = vadd.xlane.f32.xlu0 %v260_v9 }
 0x23c   :  { %497 = vmatpush.msrb.mxu3 %v1244_v10 }
 0x23e   :  { %v381_v22 = vpop.permute.xlu1 %380 }
 0x240   :  { %628 = vrot.lane.b32.xlu2 %v1556_v13, %s1480_s21 }
 0x248   :  { %622 = vrot.lane.b32.xlu2 %v1561_v15, %s1481_s22 }
 0x24f   :  { %382 = vrot.lane.b32.xlu0 %v1553_v11, %s1477_s2 }
 0x257   :  { %626 = vrot.lane.b32.xlu0 %v1561_v15, %s1480_s21 }
 0x25f   :  { %624 = vrot.lane.b32.xlu0 %v1556_v13, %s1481_s22 }
 0x271   :  { %228 = vmax.xlane.f32.xlu2 %v227_v12 }
 0x289   :  { %231 = vmax.xlane.f32.xlu0 %v230_v14 }
 0x29b   :  { %v259_v18 = vpop.xlane.xlu2 %258 }
 0x29c   :  { %1285 = vrcp.f32 %v259_v18 }
 0x29d   :  { %1251 = vrot.lane.b32.xlu0 %v1577_v17, %s1479_s20 }
 0x2a2   :  { %v1286_v19 = vpop.eup %1285 }
 0x2a3   :  { %v269_v20 = vmul.f32 %v1286_v19, %v1278_v54  ;;  %v629_v26 = vpop.permute.xlu2 %628 }
 0x2a5   :  { %1157 = vmatmul.msk.f32.vlgmr.msrb.gmra.mxu2 %vm226_vm2, %v269_v20 }
 0x2a6   :  { %v452_v21 = vpop.xlane.xlu0 %451 }
 0x2ab   :  { %v623_v35 = vpop.permute.xlu2 %622 }
 0x2ad   :  { %1165 = vmatmul.msk.f32.vlgmr.msra.gmra.mxu2 %vm151_vm1, %v381_v22 }
 0x2ae   :  { %v262_v23 = vpop.xlane.xlu0 %261  ;;  %v455_v27 = vpop.xlane.xlu1 %454 }
 0x2af   :  { %1287 = vrcp.f32 %v262_v23 }
 0x2b0   :  { %1289 = vrcp.f32 %v452_v21 }
 0x2b1   :  { %1291 = vrcp.f32 %v455_v27 }
 0x2b5   :  { %v1288_v24 = vpop.eup %1287 }
 0x2b6   :  { %v270_v25 = vmul.f32 %v1288_v24, %v1282_v5  ;;  %v1290_v28 = vpop.eup %1289 }
 0x2b7   :  { %v466_v29 = vmul.f32 %v1290_v28, %v1280_v0  ;;  %v1292_v31 = vpop.eup %1291 }
 0x2b8   :  { %1158 = vmatmul.msk.f32.vlgmr.msra.gmra.mxu3 %vm226_vm2, %v270_v25  ;;  %v467_v33 = vmul.f32 %v1292_v31, %v1284_v7  ;;  %v141_v31 = vld [vmem:[#allocation8] sm:$0xff] }
 0x2b9   :  { %1179 = vmatpush.xpose.msk.msra.mxu3 %vm151_vm1, %v629_v26  ;;  %608 = vmatpush.msrb.mxu2 %v141_v31 }
 0x2c0   :  { %1167 = vmatmul.msk.f32.vlgmr.msrb.gmra.mxu3 %vm226_vm2, %v466_v29 }
 0x2c1   :  { %v383_v30 = vpop.permute.xlu0 %382 }
 0x2c2   :  { %1166 = vmatmul.msk.f32.gmra.mxu2 %vm151_vm1, %v383_v30 }
 0x2c8   :  { %1168 = vmatmul.msk.f32.gmra.mxu3 %vm226_vm2, %v467_v33 }
 0x2c9   :  { %v627_v34 = vpop.permute.xlu0 %626 }
 0x2ca   :  { %1180 = vmatpush.xpose.msk.msra.mxu3 %vm151_vm1, %v627_v34 }
 0x2d0   :  { %1181 = vmatmul.msk.f32.vlgmr.msra.gmra.mxu3 %vm151_vm1, %v623_v35 }
 0x2d1   :  { %v625_v36 = vpop.permute.xlu0 %624 }
 0x2d8   :  { %1182 = vmatmul.msk.f32.gmra.mxu3 %vm151_vm1, %v625_v36 }
 0x2e4   :  { %v229_v37 = vpop.xlane.xlu2 %228 }
 0x2e5   :  { %v239_v39 = vsub.f32 %v1598_v32, %v229_v37  ;;  %v142_v32 = vld [vmem:[#allocation8 + $0x8] sm:$0xff] }
 0x2e6   :  { %567 = vmatpush.msrb.mxu1 %v142_v32 }
 0x2e7   :  { %v243_v40 = vmul.f32 1.442695, %v239_v39 }
 0x2e9   :  { %1293 = vpow2.f32 %v243_v40 }
 0x2ef   :  { %v1294_v42 = vpop.eup %1293 }
 0x2f0   :  { %v251_v43 = vsel %vm226_vm2, %v1294_v42, 0.0 }
 0x2f1   :  { %252 = vadd.xlane.f32.xlu1 %v251_v43 }
 0x2fc   :  { %v232_v44 = vpop.xlane.xlu0 %231 }
 0x2fd   :  { %v240_v45 = vsub.f32 %v1601_v38, %v232_v44 }
 0x2ff   :  { %v245_v47 = vmul.f32 1.442695, %v240_v45 }
 0x301   :  { %1295 = vpow2.f32 %v245_v47 }
 0x307   :  { %v1296_v48 = vpop.eup %1295 }
 0x308   :  { %v254_v49 = vsel %vm226_vm2, %v1296_v48, 0.0 }
 0x309   :  { %255 = vadd.xlane.f32.xlu2 %v254_v49 }
 0x30a   :  { %1246 = vrot.lane.b32.xlu1 %v1618_v50, %s1478_s19 }
 0x30f   :  { %v1252_v7 = vpop.permute.xlu0 %1251 }
 0x310   :  { %v1253_v10 = vunpack.i.l.bf16 %v1252_v7  ;;  %v1254_v12 = vunpack.i.h.bf16 %v1252_v7 }
 0x321   :  { %667 = vrot.lane.b32.xlu2 %v1553_v11, %s1480_s21 }
 0x328   :  { %v1661_v51 = vpop.f32.mrf.mxu2 }
 0x330   :  { %v413_v52 = vpop.f32.mrf.mxu2 }
 0x331   :  { %v424_v53 = vadd.f32 %v1603_v41, %v413_v52  ;;  %v1673_v41 = vld [vmem:[#allocation7 + $0x20] sm:$0xff] }
 0x333   :  { %v432_v38 = vsel %vm226_vm2, %v424_v53, -inf }
 0x334   :  { %433 = vmax.xlane.f32.xlu0 %v432_v38 }
 0x33b   :  { %v1665_v54 = vpop.f32.mrf.mxu3 }
 0x343   :  { %v499_v55 = vpop.f32.mrf.mxu3 }
 0x344   :  { %1171 = vmatmul.msk.f32.vlgmr.msrb.gmra.mxu1 %vm151_vm1, %v499_v55 }
 0x345   :  { %v416_v56 = vpop.f32.mrf.mxu2 }
 0x346   :  { %v425_v57 = vadd.f32 %v1608_v46, %v416_v56 }
 0x348   :  { %870 = vrot.lane.b32.xlu0 %v1561_v15, %s1482_s23  ;;  %v435_v58 = vsel %vm226_vm2, %v425_v57, -inf }
 0x34a   :  { %436 = vmax.xlane.f32.xlu2 %v435_v58 }
 0x34b   :  { %v502_v59 = vpop.f32.mrf.mxu3 }
 0x34c   :  { %1172 = vmatmul.msk.f32.gmra.mxu1 %vm151_vm1, %v502_v59 }
 0x353   :  { %v655_v60 = vpop.f32.mrf.mxu3 }
 0x354   :  { %v703_v61 = vadd.f32 %v1673_v41, %v655_v60 }
 0x356   :  { %v707_v62 = vsel %vm226_vm2, %v703_v61, -inf }
 0x357   :  { %708 = vmax.xlane.f32.xlu1 %v707_v62 }
 0x35b   :  { %v658_v46 = vpop.f32.mrf.mxu3 }
 0x35c   :  { %v1684_v0 = vadd.f32 %v1679_v63, %v658_v46 }
 0x35e   :  { %v710_v1 = vsel %vm226_vm2, %v1684_v0, -inf }
 0x362   :  { %661 = vrot.lane.b32.xlu2 %v1563_v16, %s1481_s22 }
 0x364   :  { %v253_v2 = vpop.xlane.xlu1 %252 }
 0x365   :  { %1297 = vrcp.f32 %v253_v2 }
 0x36a   :  { %1256 = vrot.lane.b32.xlu2 %v1618_v50, %s1483_s24 }
 0x36b   :  { %v1298_v5 = vpop.eup %1297 }
 0x36c   :  { %v267_v9 = vmul.f32 %v1298_v5, %v1294_v42 }
 0x370   :  { %665 = vrot.lane.b32.xlu1 %v1563_v16, %s1480_s21 }
 0x372   :  { %711 = vmax.xlane.f32.xlu0 %v710_v1 }
 0x378   :  { %872 = vrot.lane.b32.xlu1 %v1556_v13, %s1482_s23 }
 0x37c   :  { %v256_v3 = vpop.xlane.xlu2 %255  ;;  %v1247_v4 = vpop.permute.xlu1 %1246 }
 0x37d   :  { %v1248_v6 = vunpack.i.l.bf16 %v1247_v4  ;;  %1299 = vrcp.f32 %v256_v3  ;;  %v1249_v8 = vunpack.i.h.bf16 %v1247_v4 }
 0x37f   :  { %297 = vmatpush.msrb.mxu0 %v1248_v6 }
 0x380   :  { %663 = vrot.lane.b32.xlu1 %v1553_v11, %s1481_s22 }
 0x381   :  { %298 = vmatpush.msrb.mxu0 %v1249_v8  ;;  %v945_v8 = vld [vmem:[#allocation7 + $0x30] sm:$0xff] }
 0x382   :  { %1155 = vmatmul.msk.f32.vlgmr.msrb.gmra.mxu0 %vm226_vm2, %v267_v9 }
 0x383   :  { %531 = vmatpush.msra.mxu0 %v1253_v10  ;;  %v1300_v18 = vpop.eup %1299 }
 0x384   :  { %v668_v14 = vpop.permute.xlu2 %667  ;;  %v268_v19 = vmul.f32 %v1300_v18, %v1296_v48  ;;  %v143_v18 = vld [vmem:[#allocation8 + $0x10] sm:$0xff] }
 0x385   :  { %532 = vmatpush.msra.mxu0 %v1254_v12  ;;  %848 = vmatpush.msra.mxu1 %v143_v18 }
 0x386   :  { %909 = vrot.lane.b32.xlu0 %v1563_v16, %s1482_s23 }
 0x387   :  { %1183 = vmatpush.xpose.msk.msrb.mxu0 %vm151_vm1, %v668_v14 }
 0x388   :  { %866 = vrot.lane.b32.xlu1 %v1561_v15, %s1484_s25 }
 0x38a   :  { %1156 = vmatmul.msk.f32.gmra.mxu0 %vm226_vm2, %v268_v19 }
 0x390   :  { %911 = vrot.lane.b32.xlu1 %v1553_v11, %s1482_s23 }
 0x398   :  { %868 = vrot.lane.b32.xlu1 %v1556_v13, %s1484_s25 }
 0x3a7   :  { %v434_v20 = vpop.xlane.xlu0 %433 }
 0x3a8   :  { %v440_v21 = vsub.f32 %v424_v53, %v434_v20 }
 0x3aa   :  { %v446_v22 = vmul.f32 1.442695, %v440_v21 }
 0x3ac   :  { %1301 = vpow2.f32 %v446_v22 }
 0x3b2   :  { %v1302_v23 = vpop.eup %1301 }
 0x3b3   :  { %v456_v24 = vsel %vm226_vm2, %v1302_v23, 0.0 }
 0x3b4   :  { %457 = vadd.xlane.f32.xlu2 %v456_v24  ;;  %v946_v24 = vld [vmem:[#allocation7 + $0x38] sm:$0xff] }
 0x3ba   :  { %v871_v40 = vpop.permute.xlu0 %870 }
 0x3bd   :  { %v437_v25 = vpop.xlane.xlu2 %436 }
 0x3be   :  { %v441_v26 = vsub.f32 %v425_v57, %v437_v25 }
 0x3c0   :  { %v448_v15 = vmul.f32 1.442695, %v441_v26 }
 0x3c2   :  { %1303 = vpow2.f32 %v448_v15 }
 0x3c5   :  { %v662_v27 = vpop.permute.xlu2 %661 }
 0x3c8   :  { %v1304_v28 = vpop.eup %1303 }
 0x3c9   :  { %v459_v29 = vsel %vm226_vm2, %v1304_v28, 0.0 }
 0x3ca   :  { %v709_v30 = vpop.xlane.xlu1 %708  ;;  %460 = vadd.xlane.f32.xlu2 %v459_v29 }
 0x3cb   :  { %v719_v13 = vsub.f32 %v703_v61, %v709_v30 }
 0x3cd   :  { %v723_v33 = vmul.f32 1.442695, %v719_v13  ;;  %v1257_v34 = vpop.permute.xlu2 %1256 }
 0x3ce   :  { %v1258_v35 = vunpack.i.l.bf16 %v1257_v34  ;;  %v1259_v36 = vunpack.i.h.bf16 %v1257_v34 }
 0x3cf   :  { %1305 = vpow2.f32 %v723_v33 }
 0x3d0   :  { %777 = vmatpush.msrb.mxu3 %v1258_v35 }
 0x3d2   :  { %778 = vmatpush.msrb.mxu3 %v1259_v36 }
 0x3d5   :  { %v1306_v37 = vpop.eup %1305 }
 0x3d6   :  { %v731_v39 = vsel %vm226_vm2, %v1306_v37, 0.0 }
 0x3d7   :  { %732 = vadd.xlane.f32.xlu0 %v731_v39 }
 0x3e2   :  { %v666_v42 = vpop.permute.xlu1 %665 }
 0x3e3   :  { %1184 = vmatpush.xpose.msk.msrb.mxu0 %vm151_vm1, %v666_v42 }
 0x3e5   :  { %v712_v43 = vpop.xlane.xlu0 %711 }
 0x3e6   :  { %v720_v44 = vsub.f32 %v1684_v0, %v712_v43 }
 0x3e8   :  { %v725_v45 = vmul.f32 1.442695, %v720_v44 }
 0x3ea   :  { %1307 = vpow2.f32 %v725_v45  ;;  %v873_v47 = vpop.permute.xlu1 %872 }
 0x3eb   :  { %1195 = vmatpush.xpose.msk.msra.mxu2 %vm151_vm1, %v873_v47  ;;  %905 = vrot.lane.b32.xlu0 %v1563_v16, %s1484_s25 }
 0x3ef   :  { %1196 = vmatpush.xpose.msk.msra.mxu2 %vm151_vm1, %v871_v40 }
 0x3f0   :  { %v1308_v48 = vpop.eup %1307 }
 0x3f1   :  { %v734_v49 = vsel %vm226_vm2, %v1308_v48, 0.0 }
 0x3f2   :  { %v664_v32 = vpop.permute.xlu1 %663  ;;  %735 = vadd.xlane.f32.xlu2 %v734_v49 }
 0x3f8   :  { %v910_v55 = vpop.permute.xlu0 %909 }
 0x3fa   :  { %v867_v52 = vpop.permute.xlu1 %866 }
 0x3ff   :  { %v300_v53 = vpop.f32.mrf.mxu0 }
 0x400   :  { %1175 = vmatmul.msk.f32.vlgmr.msrb.gmra.mxu2 %vm151_vm1, %v300_v53 }
 0x402   :  { %v912_v38 = vpop.permute.xlu1 %911 }
 0x403   :  { %1199 = vmatpush.xpose.msk.msra.mxu3 %vm151_vm1, %v912_v38 }
 0x407   :  { %1200 = vmatpush.xpose.msk.msra.mxu3 %vm151_vm1, %v910_v55  ;;  %v303_v56 = vpop.f32.mrf.mxu0 }
 0x408   :  { %1176 = vmatmul.msk.f32.gmra.mxu2 %vm151_vm1, %v303_v56 }
 0x40a   :  { %907 = vrot.lane.b32.xlu2 %v1553_v11, %s1484_s25  ;;  %v869_v16 = vpop.permute.xlu1 %868 }
 0x410   :  { %1177 = vmatmul.msk.f32.gmra.mxu2 %vm151_vm1, %v1661_v51 }
 0x418   :  { %1178 = vmatmul.msk.f32.gmra.mxu2 %vm151_vm1, %v1665_v54 }
 0x420   :  { %1197 = vmatmul.msk.f32.vlgmr.msra.gmra.mxu2 %vm151_vm1, %v867_v52 }
 0x427   :  { %v458_v57 = vpop.xlane.xlu2 %457 }
 0x428   :  { %1309 = vrcp.f32 %v458_v57  ;;  %1198 = vmatmul.msk.f32.gmra.mxu2 %vm151_vm1, %v869_v16 }
 0x42e   :  { %v1310_v58 = vpop.eup %1309 }
 0x42f   :  { %v468_v59 = vmul.f32 %v1310_v58, %v1302_v23 }
 0x431   :  { %1169 = vmatmul.msk.f32.vlgmr.msra.gmra.mxu0 %vm226_vm2, %v468_v59 }
 0x43d   :  { %v461_v60 = vpop.xlane.xlu2 %460 }
 0x43e   :  { %1311 = vrcp.f32 %v461_v60 }
 0x444   :  { %v1312_v11 = vpop.eup %1311 }
 0x445   :  { %v469_v61 = vmul.f32 %v1312_v11, %v1304_v28 }
 0x447   :  { %1170 = vmatmul.msk.f32.gmra.mxu0 %vm226_vm2, %v469_v61 }
 0x44a   :  { %v733_v51 = vpop.xlane.xlu0 %732 }
 0x44b   :  { %1313 = vrcp.f32 %v733_v51 }
 0x44f   :  { %1185 = vmatmul.msk.f32.vlgmr.msrb.gmra.mxu0 %vm151_vm1, %v662_v27 }
 0x451   :  { %v1314_v54 = vpop.eup %1313 }
 0x452   :  { %v747_v62 = vmul.f32 %v1314_v54, %v1306_v37 }
 0x454   :  { %1187 = vmatmul.msk.f32.vlgmr.msrb.gmra.mxu3 %vm226_vm2, %v747_v62 }
 0x457   :  { %1186 = vmatmul.msk.f32.gmra.mxu0 %vm151_vm1, %v664_v32 }
 0x45d   :  { %v906_v2 = vpop.permute.xlu0 %905 }
 0x465   :  { %v736_v46 = vpop.xlane.xlu2 %735 }
 0x466   :  { %1315 = vrcp.f32 %v736_v46 }
 0x46c   :  { %v1316_v0 = vpop.eup %1315 }
 0x46d   :  { %v748_v1 = vmul.f32 %v1316_v0, %v1308_v48  ;;  %v908_v3 = vpop.permute.xlu2 %907 }
 0x46f   :  { %1188 = vmatmul.msk.f32.gmra.mxu3 %vm226_vm2, %v748_v1 }
 0x477   :  { %1201 = vmatmul.msk.f32.vlgmr.msra.gmra.mxu3 %vm151_vm1, %v906_v2 }
 0x47f   :  { %1202 = vmatmul.msk.f32.gmra.mxu3 %vm151_vm1, %v908_v3 }
 0x483   :  { %v1735_v4 = vpop.f32.mrf.mxu2 }
 0x48b   :  { %v1737_v5 = vpop.f32.mrf.mxu2 }
 0x493   :  { %v1739_v6 = vpop.f32.mrf.mxu2 }
 0x49b   :  { %v1741_v7 = vpop.f32.mrf.mxu2 }
 0x4a3   :  { %v899_v9 = vpop.f32.mrf.mxu2 }
 0x4a4   :  { %v947_v10 = vadd.f32 %v945_v8, %v899_v9 }
 0x4a6   :  { %v951_v12 = vsel %vm226_vm2, %v947_v10, -inf }
 0x4a7   :  { %952 = vmax.xlane.f32.xlu2 %v951_v12 }
 0x4ab   :  { %v902_v23 = vpop.f32.mrf.mxu2 }
 0x4ac   :  { %v948_v25 = vadd.f32 %v946_v24, %v902_v23 }
 0x4ae   :  { %v534_v14 = vpop.f32.mrf.mxu0  ;;  %v954_v28 = vsel %vm226_vm2, %v948_v25, -inf }
 0x4af   :  { %1173 = vmatmul.msk.f32.gmra.mxu1 %vm151_vm1, %v534_v14 }
 0x4c4   :  { %v537_v19 = vpop.f32.mrf.mxu0 }
 0x4c5   :  { %1174 = vmatmul.msk.f32.gmra.mxu1 %vm151_vm1, %v537_v19 }
 0x4cc   :  { %v694_v20 = vpop.f32.mrf.mxu0 }
 0x4cd   :  { %v705_v21 = vadd.f32 %v1673_v41, %v694_v20 }
 0x4cf   :  { %v713_v22 = vsel %vm226_vm2, %v705_v21, -inf }
 0x4d0   :  { %714 = vmax.xlane.f32.xlu1 %v713_v22 }
 0x4d4   :  { %v697_v26 = vpop.f32.mrf.mxu0 }
 0x4d5   :  { %v706_v15 = vadd.f32 %v1679_v63, %v697_v26 }
 0x4d7   :  { %v780_v27 = vpop.f32.mrf.mxu3  ;;  %v716_v29 = vsel %vm226_vm2, %v706_v15, -inf }
 0x4d8   :  { %955 = vmax.xlane.f32.xlu1 %v954_v28  ;;  %717 = vmax.xlane.f32.xlu0 %v716_v29 }
 0x4d9   :  { %1191 = vmatmul.msk.f32.vlgmr.msra.gmra.mxu1 %vm151_vm1, %v780_v27 }
 0x4f2   :  { %v783_v30 = vpop.f32.mrf.mxu3 }
 0x4f3   :  { %1192 = vmatmul.msk.f32.gmra.mxu1 %vm151_vm1, %v783_v30 }
 0x4fa   :  { %v938_v41 = vpop.f32.mrf.mxu3 }
 0x4fb   :  { %v949_v31 = vadd.f32 %v945_v8, %v938_v41 }
 0x4fd   :  { %v957_v13 = vsel %vm226_vm2, %v949_v31, -inf }
 0x4fe   :  { %958 = vmax.xlane.f32.xlu0 %v957_v13 }
 0x502   :  { %v941_v33 = vpop.f32.mrf.mxu3 }
 0x503   :  { %v950_v34 = vadd.f32 %v946_v24, %v941_v33  ;;  %v144_v33 = vld [vmem:[#allocation8 + $0x18] sm:$0xff] }
 0x504   :  { %1092 = vmatpush.msrb.mxu3 %v144_v33 }
 0x505   :  { %v960_v63 = vsel %vm226_vm2, %v950_v34, -inf }
 0x506   :  { %961 = vmax.xlane.f32.xlu1 %v960_v63 }
 0x51a   :  { %v953_v35 = vpop.xlane.xlu2 %952 }
 0x51b   :  { %v963_v36 = vsub.f32 %v947_v10, %v953_v35 }
 0x51d   :  { %v967_v37 = vmul.f32 1.442695, %v963_v36 }
 0x51f   :  { %1317 = vpow2.f32 %v967_v37  ;;  %1261 = vrot.lane.b32.xlu1 %v1577_v17, %s1483_s24 }
 0x525   :  { %v1757_v39 = vpop.eup %1317 }
 0x526   :  { %v975_v40 = vsel %vm226_vm2, %v1757_v39, 0.0 }
 0x527   :  { %976 = vadd.xlane.f32.xlu2 %v975_v40  ;;  %1271 = vrot.lane.b32.xlu1 %v1577_v17, %s1485_s26  ;;  %v569_v40 = vpop.f32.mrf.mxu1 }
 0x543   :  { %v715_v42 = vpop.xlane.xlu1 %714 }
 0x544   :  { %v721_v43 = vsub.f32 %v705_v21, %v715_v42  ;;  %v572_v42 = vpop.f32.mrf.mxu1 }
 0x546   :  { %v727_v44 = vmul.f32 1.442695, %v721_v43 }
 0x548   :  { %1319 = vpow2.f32 %v727_v44 }
 0x54b   :  { %v956_v45 = vpop.xlane.xlu1 %955  ;;  %v718_v47 = vpop.xlane.xlu0 %717 }
 0x54c   :  { %v964_v48 = vsub.f32 %v948_v25, %v956_v45  ;;  %v722_v49 = vsub.f32 %v706_v15, %v718_v47  ;;  %v575_v43 = vpop.f32.mrf.mxu1  ;;  %v611_v47 = vadd.f32 %v1735_v4, %v569_v40 }
 0x54e   :  { %v1320_v32 = vpop.eup %1319  ;;  %v969_v52 = vmul.f32 1.442695, %v964_v48  ;;  %v729_v53 = vmul.f32 1.442695, %v722_v49  ;;  %v1276_v49 = vld [vmem:[%s1803_s5] ss:$0 sm:$0xff] }
 0x54f   :  { %v737_v38 = vsel %vm226_vm2, %v1320_v32, 0.0  ;;  %s1486_s5 = smov [#allocation10]  }
 0x550   :  { %1321 = vpow2.f32 %v969_v52  ;;  %738 = vadd.xlane.f32.xlu0 %v737_v38  ;;  %s1126_s7 = sshll.u32 %s1486_s5, 4  ;;  %s1127_s7 = int_to_ptr.vmem [resolvable:$true] %s1126_s7 }
 0x551   :  { %1323 = vpow2.f32 %v729_v53 }
 0x554   :  { %v578_v44 = vpop.f32.mrf.mxu1 }
 0x556   :  { %v1322_v55 = vpop.eup %1321 }
 0x557   :  { %v1324_v56 = vpop.eup %1323  ;;  %v978_v17 = vsel %vm226_vm2, %v1322_v55, 0.0 }
 0x558   :  { %979 = vadd.xlane.f32.xlu2 %v978_v17  ;;  %v740_v16 = vsel %vm226_vm2, %v1324_v56, 0.0 }
 0x559   :  { %741 = vadd.xlane.f32.xlu0 %v740_v16 }
 0x55c   :  { %v850_v45 = vpop.f32.mrf.mxu1 }
 0x55d   :  { %v862_v48 = vadd.f32 %v850_v45, %v611_v47 }
 0x56d   :  { %1266 = vrot.lane.b32.xlu0 %v1618_v50, %s1485_s26 }
 0x570   :  { %v853_v38 = vpop.f32.mrf.mxu1 }
 0x571   :  { %v959_v57 = vpop.xlane.xlu0 %958 }
 0x572   :  { %v965_v58 = vsub.f32 %v949_v31, %v959_v57 }
 0x574   :  { %v971_v59 = vmul.f32 1.442695, %v965_v58  ;;  %v617_v58 = vadd.f32 %v1739_v6, %v575_v43 }
 0x576   :  { %1325 = vpow2.f32 %v971_v59 }
 0x579   :  { %v962_v60 = vpop.xlane.xlu1 %961 }
 0x57a   :  { %v966_v11 = vsub.f32 %v950_v34, %v962_v60 }
 0x57c   :  { %v1326_v61 = vpop.eup %1325  ;;  %v973_v51 = vmul.f32 1.442695, %v966_v11 }
 0x57d   :  { %v981_v54 = vsel %vm226_vm2, %v1326_v61, 0.0 }
 0x57e   :  { %1327 = vpow2.f32 %v973_v51  ;;  %982 = vadd.xlane.f32.xlu2 %v981_v54  ;;  %v620_v54 = vadd.f32 %v1741_v7, %v578_v44 }
 0x584   :  { %v1328_v62 = vpop.eup %1327 }
 0x585   :  { %v984_v46 = vsel %vm226_vm2, %v1328_v62, 0.0 }
 0x586   :  { %985 = vadd.xlane.f32.xlu2 %v984_v46 }
 0x591   :  { %v1262_v0 = vpop.permute.xlu1 %1261 }
 0x592   :  { %v1263_v1 = vunpack.i.l.bf16 %v1262_v0  ;;  %v1264_v2 = vunpack.i.h.bf16 %v1262_v0 }
 0x594   :  { %812 = vmatpush.msra.mxu0 %v1263_v1 }
 0x596   :  { %813 = vmatpush.msra.mxu0 %v1264_v2 }
 0x599   :  { %v1272_v50 = vpop.permute.xlu1 %1271 }
 0x59a   :  { %v1273_v3 = vunpack.i.l.bf16 %v1272_v50  ;;  %v1274_v8 = vunpack.i.h.bf16 %v1272_v50  ;;  %v977_v20 = vpop.xlane.xlu2 %976 }
 0x59c   :  { %1056 = vmatpush.msrb.mxu2 %v1273_v3 }
 0x59e   :  { %1057 = vmatpush.msrb.mxu2 %v1274_v8 }
 0x5c3   :  { %v739_v9 = vpop.xlane.xlu0 %738 }
 0x5c4   :  { %1329 = vrcp.f32 %v739_v9 }
 0x5ca   :  { %v1330_v10 = vpop.eup %1329 }
 0x5cb   :  { %v749_v12 = vmul.f32 %v1330_v10, %v1320_v32  ;;  %v980_v21 = vpop.xlane.xlu2 %979 }
 0x5cc   :  { %v742_v14 = vpop.xlane.xlu0 %741 }
 0x5cd   :  { %1331 = vrcp.f32 %v742_v14  ;;  %1189 = vmatmul.msk.f32.vlgmr.msra.gmra.mxu0 %vm226_vm2, %v749_v12 }
 0x5ce   :  { %1333 = vrcp.f32 %v977_v20 }
 0x5cf   :  { %1335 = vrcp.f32 %v980_v21 }
 0x5d3   :  { %v1332_v18 = vpop.eup %1331 }
 0x5d4   :  { %v750_v19 = vmul.f32 %v1332_v18, %v1324_v56  ;;  %v1334_v23 = vpop.eup %1333 }
 0x5d5   :  { %v991_v26 = vmul.f32 %v1334_v23, %v1757_v39  ;;  %v1336_v15 = vpop.eup %1335 }
 0x5d6   :  { %1190 = vmatmul.msk.f32.gmra.mxu0 %vm226_vm2, %v750_v19  ;;  %v992_v27 = vmul.f32 %v1336_v15, %v1322_v55  ;;  %v614_v55 = vadd.f32 %v1737_v5, %v572_v42 }
 0x5d8   :  { %v863_v56 = vadd.f32 %v853_v38, %v614_v55 }
 0x5df   :  { %v1267_v22 = vpop.permute.xlu0 %1266 }
 0x5e0   :  { %v1268_v24 = vunpack.i.l.bf16 %v1267_v22  ;;  %v1269_v25 = vunpack.i.h.bf16 %v1267_v22 }
 0x5e2   :  { %1021 = vmatpush.msrb.mxu0 %v1268_v24 }
 0x5e4   :  { %1022 = vmatpush.msrb.mxu0 %v1269_v25 }
 0x5e5   :  { %1203 = vmatmul.msk.f32.vlgmr.msrb.gmra.mxu0 %vm226_vm2, %v991_v26 }
 0x5ed   :  { %1204 = vmatmul.msk.f32.gmra.mxu0 %vm226_vm2, %v992_v27 }
 0x5f1   :  { %v983_v28 = vpop.xlane.xlu2 %982 }
 0x5f2   :  { %1337 = vrcp.f32 %v983_v28 }
 0x5f8   :  { %v1338_v29 = vpop.eup %1337 }
 0x5f9   :  { %v993_v30 = vmul.f32 %v1338_v29, %v1326_v61  ;;  %v986_v41 = vpop.xlane.xlu2 %985 }
 0x5fa   :  { %1339 = vrcp.f32 %v986_v41 }
 0x5fb   :  { %1205 = vmatmul.msk.f32.vlgmr.msrb.gmra.mxu2 %vm226_vm2, %v993_v30 }
 0x600   :  { %v1340_v31 = vpop.eup %1339 }
 0x601   :  { %v994_v13 = vmul.f32 %v1340_v31, %v1328_v62 }
 0x603   :  { %1206 = vmatmul.msk.f32.gmra.mxu2 %vm226_vm2, %v994_v13 }
 0x64a   :  { %v815_v34 = vpop.f32.mrf.mxu0 }
 0x64b   :  { %1193 = vmatmul.msk.f32.gmra.mxu1 %vm151_vm1, %v815_v34 }
 0x653   :  { %v818_v63 = vpop.f32.mrf.mxu0 }
 0x654   :  { %1194 = vmatmul.msk.f32.gmra.mxu1 %vm151_vm1, %v818_v63 }
 0x662   :  { %v1024_v35 = vpop.f32.mrf.mxu0 }
 0x663   :  { %1207 = vmatmul.msk.f32.vlgmr.msrb.gmra.mxu3 %vm151_vm1, %v1024_v35 }
 0x66a   :  { %v1027_v36 = vpop.f32.mrf.mxu0 }
 0x66b   :  { %1208 = vmatmul.msk.f32.gmra.mxu3 %vm151_vm1, %v1027_v36 }
 0x67e   :  { %v1059_v37 = vpop.f32.mrf.mxu2 }
 0x67f   :  { %1209 = vmatmul.msk.f32.gmra.mxu3 %vm151_vm1, %v1059_v37 }
 0x686   :  { %v1062_v39 = vpop.f32.mrf.mxu2 }
 0x687   :  { %1210 = vmatmul.msk.f32.gmra.mxu3 %vm151_vm1, %v1062_v39 }
 0x6c8   :  { %v856_v4 = vpop.f32.mrf.mxu1 }
 0x6c9   :  { %v864_v59 = vadd.f32 %v856_v4, %v617_v58 }
 0x6d1   :  { %v859_v51 = vpop.f32.mrf.mxu1 }
 0x6d2   :  { %v865_v5 = vadd.f32 %v859_v51, %v620_v54 }
 0x6e6   :  { %v1094_v32 = vpop.f32.mrf.mxu3 }
 0x6e7   :  { %v1106_v52 = vadd.f32 %v1094_v32, %v862_v48 }
 0x6e9   :  { %v1114_v53 = vadd.f32 %v1276_v49, %v1106_v52 }
 0x6eb   :  { %1118 = vst.msk [vmem:[#allocation10] sm:$0xff] %vm99_vm0, %v1114_v53 }
 0x6ee   :  { %v1097_v17 = vpop.f32.mrf.mxu3 }
 0x6ef   :  { %v1107_v16 = vadd.f32 %v1097_v17, %v863_v56 }
 0x6f1   :  { %v1115_v57 = vadd.f32 %v1276_v49, %v1107_v16 }
 0x6f3   :  { %1119 = vst.msk [vmem:[#allocation10 + $0x8] sm:$0xff] %vm99_vm0, %v1115_v57 }
 0x702   :  { %v1100_v60 = vpop.f32.mrf.mxu3 }
 0x703   :  { %v1108_v11 = vadd.f32 %v1100_v60, %v864_v59 }
 0x705   :  { %v1116_v61 = vadd.f32 %v1276_v49, %v1108_v11 }
 0x707   :  { %1120 = vst.msk [vmem:[#allocation10 + $0x10] sm:$0xff] %vm99_vm0, %v1116_v61 }
 0x70a   :  { %v1103_v62 = vpop.f32.mrf.mxu3 }
 0x70b   :  { %v1109_v46 = vadd.f32 %v1103_v62, %v865_v5 }
 0x70d   :  { %v1117_v0 = vadd.f32 %v1276_v49, %v1109_v46 }
 0x70f   :  { %1121 = vst.msk [vmem:[#allocation10 + $0x18] sm:$0xff] %vm99_vm0, %v1117_v0 }
 0x710   :  { %1134 = dma.vmem_to_hbm [thread:$0]  %s1127_s7, 512, %s1129_s10, [#allocation4], %s1470_s29, %s1470_s29, %s1471_s30  }
 0x711   :  { %1467 = dma.done.wait [#allocation4], 512  }
 0x712   :  { %1468 = vsyncadd [#allocation4], 4294966784 }
 0x713   :  { %1139 = vsyncpa [#allocation3], 1 }
 0x714   :  { %1140 = vsyncpa [#allocation6], 1 }
 0x715   :  { %1141 = vsyncpa [#allocation9], 1 }
 0x716   :  { %1142 = vsyncpa [#allocation4], 1 }

</bundles_post_ra>
